<compile_context>
chip_gen: v7x
topology: tpu7x:2x2x1
jax: 0.10.0
libtpu: 0.0.40
codegen_flags: <defaults>
</compile_context>

<pallas_src>
import jax
import jax.numpy as jnp
from jax.experimental import pallas as pl
from jax.experimental.pallas import tpu as pltpu


def _proj_kernel(feat_ref, w_ref, h_ref):
    # h = features @ W  (bf16 MXU inputs, f32 accumulate), lane-dense output.
    h_ref[...] = jnp.dot(feat_ref[...], w_ref[...],
                         preferred_element_type=jnp.float32)


def _att_kernel(logits_ref, h_ref, out_ref, m_sc, l_sc, acc_sc):
    # Flash-style online softmax over the neighbor (kv) grid axis, then
    # attention @ h (bf16 MXU) and ELU(alpha=1), all fused.
    kv = pl.program_id(1)

    @pl.when(kv == 0)
    def _():
        m_sc[...] = jnp.full(m_sc.shape, -jnp.inf, m_sc.dtype)
        l_sc[...] = jnp.zeros(l_sc.shape, l_sc.dtype)
        acc_sc[...] = jnp.zeros(acc_sc.shape, acc_sc.dtype)

    s = logits_ref[...]                                          # (tt, nk) f32
    m_new = jnp.maximum(m_sc[...], jnp.max(s, axis=-1, keepdims=True))
    alpha = jnp.exp(m_sc[...] - m_new)
    p = jnp.exp(s - m_new)                                       # unnormalized
    l_sc[...] = alpha * l_sc[...] + jnp.sum(p, axis=-1, keepdims=True)
    acc_sc[...] = alpha * acc_sc[...] + jnp.dot(
        p.astype(jnp.bfloat16), h_ref[...].astype(jnp.bfloat16),
        preferred_element_type=jnp.float32)
    m_sc[...] = m_new

    @pl.when(kv == pl.num_programs(1) - 1)
    def _():
        # softmax normalization on the EUP (approx reciprocal) + ELU.
        hp = acc_sc[...] * pl.reciprocal(l_sc[...], approx=True)
        # ELU(alpha=1); clamp the exp argument so the discarded positive
        # branch cannot overflow (jnp.where evaluates both sides).
        out_ref[...] = jnp.where(hp > 0.0, hp,
                                 jnp.exp(jnp.minimum(hp, 0.0)) - 1.0)


def _round_up(x, m):
    return (x + m - 1) // m * m


def homo_att_layer(features, adj, target_len, neighbor_len, target_index_out,
                   W, a, *, leaky_alpha=0.2, tgt_tile=256, nbr_tile=512):
    """JAX/Pallas equivalent of HomoAttLayer.forward (eval mode, no dropout)."""
    N, in_dim = features.shape
    out_dim = W.shape[1]
    assert N == neighbor_len

    f32 = jnp.float32

    # ---- lane-dense / tile-aligned padded sizes -----------------------------
    d_pad = _round_up(out_dim, 128)                 # projected width -> full lanes
    nk = min(nbr_tile, _round_up(N, 128))           # neighbor-axis tile (mult of 128)
    n_pad = _round_up(N, nk)                        # padded node count
    tt = min(tgt_tile, _round_up(target_len, 8))    # target-row tile (mult of 8)
    t_pad = _round_up(target_len, tt)

    # ---- kernel 1: h = features @ W (gridded over node rows) ---------------
    feat_p = jnp.pad(features.astype(f32), ((0, n_pad - N), (0, 0)))
    w_p = jnp.pad(W.astype(f32), ((0, 0), (0, d_pad - out_dim)))

    h = pl.pallas_call(
        _proj_kernel,
        out_shape=jax.ShapeDtypeStruct((n_pad, d_pad), f32),
        grid_spec=pltpu.PrefetchScalarGridSpec(
            num_scalar_prefetch=0,
            grid=(n_pad // nk,),
            in_specs=[pl.BlockSpec((nk, in_dim), lambda i: (i, 0)),
                      pl.BlockSpec((in_dim, d_pad), lambda i: (0, 0))],
            out_specs=pl.BlockSpec((nk, d_pad), lambda i: (i, 0))),
        compiler_params=pltpu.CompilerParams(
            dimension_semantics=("parallel",),
            vmem_limit_bytes=32 * 1024 * 1024),
    )(feat_p.astype(jnp.bfloat16), w_p.astype(jnp.bfloat16))

    # ---- glue (trivial FLOPs, plain JAX) ------------------------------------
    # (cat([h_i, h_j]) @ a) == h_i @ a[:D] + h_j @ a[D:]
    a2 = a.reshape(2, out_dim).T.astype(f32)               # [out_dim, 2]
    s = h[:, :out_dim] @ a2                                 # [n_pad, 2]
    e = s[adj[0], 0] + s[adj[1], 1]                         # [E]
    e = jnp.where(e > 0, e, leaky_alpha * e)                # LeakyReLU(alpha)

    # Dense logit matrix: same -9e15 fill as the torch module in the real
    # columns; padded neighbor columns are -inf so they contribute exactly 0
    # to the softmax (preserves the uniform-attention behaviour of all-empty
    # rows over the *real* neighbor_len, matching PyTorch semantics).
    logits = jnp.full((t_pad, n_pad), -9e15, dtype=f32)
    logits = logits.at[target_index_out, adj[1]].set(e)
    logits = logits.at[:, neighbor_len:].set(-jnp.inf)

    # ---- kernel 2: fused softmax + attention @ h + ELU ----------------------
    out = pl.pallas_call(
        _att_kernel,
        out_shape=jax.ShapeDtypeStruct((t_pad, d_pad), f32),
        grid_spec=pltpu.PrefetchScalarGridSpec(
            num_scalar_prefetch=0,
            grid=(t_pad // tt, n_pad // nk),
            in_specs=[pl.BlockSpec((tt, nk), lambda i, k: (i, k)),
                      pl.BlockSpec((nk, d_pad), lambda i, k: (k, 0))],
            out_specs=pl.BlockSpec((tt, d_pad), lambda i, k: (i, 0)),
            scratch_shapes=[pltpu.VMEM((tt, 1), f32),      # running max m
                            pltpu.VMEM((tt, 1), f32),      # running sum l
                            pltpu.VMEM((tt, d_pad), f32)]),  # acc
        compiler_params=pltpu.CompilerParams(
            dimension_semantics=("parallel", "arbitrary"),
            vmem_limit_bytes=32 * 1024 * 1024),
    )(logits, h)

    return out[:target_len, :out_dim]


if __name__ == "__main__":
    key = jax.random.PRNGKey(0)
    in_dim, out_dim = 32, 16
    neighbor_len, target_len, E = 64, 32, 128
    leaky_alpha = 0.2

    k1, k2, k3, k4, k5 = jax.random.split(key, 5)

    features = jax.random.normal(k1, (neighbor_len, in_dim), dtype=jnp.float32)

    # xavier_uniform_ with gain=1.414 (deterministic, in-script)
    bW = 1.414 * (6.0 / (in_dim + out_dim)) ** 0.5
    W = jax.random.uniform(k2, (in_dim, out_dim), dtype=jnp.float32,
                           minval=-bW, maxval=bW)
    ba = 1.414 * (6.0 / (2 * out_dim + 1)) ** 0.5
    a = jax.random.uniform(k3, (2 * out_dim, 1), dtype=jnp.float32,
                           minval=-ba, maxval=ba)

    # Unique (target, neighbor) pairs so the duplicate-scatter write-order
    # ambiguity (present in the torch module too) cannot make the check flaky.
    cells = jax.random.permutation(k4, target_len * neighbor_len)[:E]
    target_index_out = (cells // neighbor_len).astype(jnp.int32)
    adj1 = (cells % neighbor_len).astype(jnp.int32)
    adj0 = jax.random.randint(k5, (E,), 0, neighbor_len)
    adj = jnp.stack([adj0, adj1])                            # [2, E]

    out = homo_att_layer(features, adj, target_len, neighbor_len,
                         target_index_out, W, a, leaky_alpha=leaky_alpha)
    out = jax.block_until_ready(out)

    # ----- pure-JAX reference of the PyTorch forward (eval mode).
    # The kernel deliberately feeds the MXU bf16 inputs (perf guidance), so
    # the reference uses the same bf16-rounded parameters but does all the
    # math in float32.
    fb = features.astype(jnp.bfloat16).astype(jnp.float32)
    Wb = W.astype(jnp.bfloat16).astype(jnp.float32)
    h_ref = fb @ Wb
    e_ref = h_ref[adj0] @ a[:out_dim, 0] + h_ref[adj1] @ a[out_dim:, 0]
    e_ref = jnp.where(e_ref > 0, e_ref, leaky_alpha * e_ref)
    logits_ref = jnp.full((target_len, neighbor_len), -9e15, jnp.float32)
    logits_ref = logits_ref.at[target_index_out, adj1].set(e_ref)
    att_ref = jax.nn.softmax(logits_ref, axis=1)
    hp_ref = att_ref @ h_ref
    ref = jnp.where(hp_ref > 0, hp_ref, jnp.expm1(hp_ref))

    assert out.shape == (target_len, out_dim)
    assert jnp.allclose(out, ref, atol=2e-2, rtol=2e-2), "mismatch vs reference"
    print("KERNEL_OK")
</pallas_src>

<mosaic_0001>
module attributes {stable_mosaic.version = 11 : i64} {
  func.func @_proj_kernel(%arg0: i32, %arg1: memref<128x32xbf16, #tpu.memory_space<vmem>>, %arg2: memref<32x128xbf16, #tpu.memory_space<vmem>>, %arg3: memref<128x128xf32, #tpu.memory_space<vmem>>) attributes {dimension_semantics = [#tpu.dimension_semantics<parallel>], iteration_bounds = array<i64: 1>, scalar_prefetch = 0 : i64, scratch_operands = 0 : i64, tpu.core_type = #tpu.core_type<tc>, window_params = [{transform_indices = @transform_0, window_bounds = array<i64: 128, 32>}, {pipeline_mode = #tpu.pipeline_mode<synchronous>, transform_indices = @transform_1, window_bounds = array<i64: 32, 128>}, {transform_indices = @transform_2, window_bounds = array<i64: 128, 128>}]} {
    %c0 = arith.constant 0 : index
    %c0_0 = arith.constant 0 : index
    %0 = vector.load %arg1[%c0, %c0_0] : memref<128x32xbf16, #tpu.memory_space<vmem>>, vector<128x32xbf16>
    %c0_1 = arith.constant 0 : index
    %c0_2 = arith.constant 0 : index
    %1 = vector.load %arg2[%c0_1, %c0_2] : memref<32x128xbf16, #tpu.memory_space<vmem>>, vector<32x128xbf16>
    %cst = arith.constant dense<0.000000e+00> : vector<128x128xf32>
    %2 = tpu.matmul %0, %1, %cst {dimension_numbers = #tpu.dot_dimension_numbers<[1], [0], [0], [1], [0, 0, 1, 1], [], []>} : vector<128x32xbf16>, vector<32x128xbf16>, vector<128x128xf32> -> vector<128x128xf32>
    %c0_3 = arith.constant 0 : index
    %c0_4 = arith.constant 0 : index
    %3 = vector.load %arg3[%c0_3, %c0_4] : memref<128x128xf32, #tpu.memory_space<vmem>>, vector<128x128xf32>
    tpu.vector_store %arg3[%c0_3, %c0_4], %2 {strides = array<i32>} : memref<128x128xf32, #tpu.memory_space<vmem>>, vector<128x128xf32>,
    return
  }
  func.func @transform_0(%arg0: i32) -> (i32, i32) {
    %c0_i32 = arith.constant 0 : i32
    %c0_i32_0 = arith.constant 0 : i32
    return %arg0, %c0_i32 : i32, i32
  }
  func.func @transform_1(%arg0: i32) -> (i32, i32) {
    %c0_i32 = arith.constant 0 : i32
    %c0_i32_0 = arith.constant 0 : i32
    %c0_i32_1 = arith.constant 0 : i32
    return %c0_i32, %c0_i32_0 : i32, i32
  }
  func.func @transform_2(%arg0: i32) -> (i32, i32) {
    %c0_i32 = arith.constant 0 : i32
    %c0_i32_0 = arith.constant 0 : i32
    return %arg0, %c0_i32 : i32, i32
  }
}

</mosaic_0001>

<bundles_post_ra>
// kernel: tpu_custom_call.1
= control target key start
LH: loop header
LB: loop body
LE: loop exit
PB: predicated region body
PF: predicated region fallthrough
CT: control target
= control target key end

     0   :  { %vm85_vm0 = vcmask 261120   ;;  %s396_s0 = inlined_call_operand.vmem [shape: bf16[128,32], index: 0, kind: input, shape index: {}]   ;;  %s397_s1 = inlined_call_operand.vmem [shape: bf16[32,128], index: 1, kind: input, shape index: {}]   ;;  %s398_s2 = inlined_call_operand.hbm [shape: f32[128,128], index: 2, kind: output, shape index: {}]  }
   0x1   :  { %v294_v0 = vld [vmem:[%s397_s1] sm:$0xff]   ;;  %v295_v1 = vld [vmem:[%s397_s1 + $0x8] sm:$0xff]   ;;  %v300_v6 = vld [vmem:[%s396_s0 + $0x10] sm:$0xff]  }
   0x2   :  { %267 = vmatprep.subr.bf16.mxu0 %v294_v0  ;;  %287 = vmatprep.subr.bf16.mxu1 %v294_v0  ;;  %v296_v2 = vld [vmem:[%s396_s0] sm:$0xff]   ;;  %v298_v4 = vld [vmem:[%s396_s0 + $0x8] sm:$0xff]   ;;  %v301_v7 = vld [vmem:[%s396_s0 + $0x30] sm:$0xff]  }
   0x3   :  { %268 = vmatpush3.bf16.msra.mxu0 %v294_v0  ;;  %289 = vmatpush3.bf16.msra.mxu1 %v294_v0  ;;  %v297_v3 = vld [vmem:[%s396_s0 + $0x20] sm:$0xff]   ;;  %v299_v5 = vld [vmem:[%s396_s0 + $0x28] sm:$0xff]  }
   0x4   :  { %269 = vmatprep.subr.bf16.mxu0 %v295_v1  ;;  %288 = vmatprep.subr.bf16.mxu1 %v295_v1 }
   0x5   :  { %271 = vmatprep.mubr.msk.bf16.mxu0 %vm85_vm0, %v296_v2  ;;  %279 = vmatprep.mubr.msk.bf16.mxu1 %vm85_vm0, %v297_v3 }
   0x7   :  { %270 = vmatpush3.bf16.msra.mxu0 %v295_v1  ;;  %290 = vmatpush3.bf16.msra.mxu1 %v295_v1 }
   0xa   :  { %272 = vmatmul.mubr.msk.bf16.vlgmr.msra.gmra.mrb[0].mxu0 %vm85_vm0, %v298_v4  ;;  %280 = vmatmul.mubr.msk.bf16.vlgmr.msra.gmra.mrb[0].mxu1 %vm85_vm0, %v299_v5 }
   0xb   :  { %7 = vsyncpa [#allocation3], 0  ;;  %275 = vmatprep.mubr.msk.bf16.mxu0 %vm85_vm0, %v300_v6  ;;  %283 = vmatprep.mubr.msk.bf16.mxu1 %vm85_vm0, %v301_v7  ;;  %v302_v8 = vld [vmem:[%s396_s0 + $0x18] sm:$0xff]  }
   0xc   :  { %v303_v9 = vld [vmem:[%s396_s0 + $0x38] sm:$0xff]   ;;  %s328_s0 = smov [#allocation2]  }
   0xd   :  { %s228_s28 = sshll.u32 %s328_s0, 4  ;;  %s229_s28 = int_to_ptr.vmem [resolvable:$true] %s228_s28 }
   0xe   :  { %s304_s29 = scalar_lea.vmem %s229_s28, 2048  ;;  %p309_p1 = scmp.lt.s32.totalorder %s229_s28, %s229_s28 }
   0xf   :  { %p305_p0 = scmp.ne.s32.totalorder %s229_s28, %s304_s29  ;;  %p310_p2 = scmp.lt.s32.totalorder %s304_s29, %s304_s29 }
  0x11   :  { %p311_p3 = por %p310_p2, %p309_p1 }
  0x12   :  { %276 = vmatmul.mubr.msk.bf16.gmra.mrb[4].mxu0 %vm85_vm0, %v302_v8  ;;  %284 = vmatmul.mubr.msk.bf16.gmra.mrb[4].mxu1 %vm85_vm0, %v303_v9 }
  0x13   :  { %p312_p4 = pnand %p311_p3, %p305_p0 }
  0xdd   :  { %v273_v10 = vpop.f32.mrb[0].mxu0  ;;  %v281_v11 = vpop.f32.mrb[0].mxu1 }
  0xde   :  { %209 = vst [vmem:[#allocation2 + $0x10] sm:$0xff] %v273_v10  ;;  %217 = vst [vmem:[#allocation2 + $0x50] sm:$0xff] %v281_v11  ;;  %v144_v12 = vpop.f32.mrb[1].mxu0  ;;  %v176_v13 = vpop.f32.mrb[1].mxu1 }
  0xdf   :  { %207 = vst [vmem:[#allocation2] sm:$0xff] %v144_v12  ;;  %215 = vst [vmem:[#allocation2 + $0x40] sm:$0xff] %v176_v13  ;;  %v274_v14 = vpop.f32.mrb[2].mxu0  ;;  %v282_v15 = vpop.f32.mrb[2].mxu1 }
  0xe0   :  { %210 = vst [vmem:[#allocation2 + $0x18] sm:$0xff] %v274_v14  ;;  %218 = vst [vmem:[#allocation2 + $0x58] sm:$0xff] %v282_v15  ;;  %v147_v16 = vpop.f32.mrb[3].mxu0  ;;  %v179_v17 = vpop.f32.mrb[3].mxu1 }
  0xe1   :  { %208 = vst [vmem:[#allocation2 + $0x8] sm:$0xff] %v147_v16  ;;  %216 = vst [vmem:[#allocation2 + $0x48] sm:$0xff] %v179_v17 }
  0xe5   :  { %v277_v18 = vpop.f32.mrb[4].mxu0  ;;  %v285_v19 = vpop.f32.mrb[4].mxu1 }
  0xe6   :  { %213 = vst [vmem:[#allocation2 + $0x30] sm:$0xff] %v277_v18  ;;  %221 = vst [vmem:[#allocation2 + $0x70] sm:$0xff] %v285_v19  ;;  %v160_v20 = vpop.f32.mrb[5].mxu0  ;;  %v192_v21 = vpop.f32.mrb[5].mxu1 }
  0xe7   :  { %211 = vst [vmem:[#allocation2 + $0x20] sm:$0xff] %v160_v20  ;;  %219 = vst [vmem:[#allocation2 + $0x60] sm:$0xff] %v192_v21  ;;  %v278_v22 = vpop.f32.mrb[6].mxu0  ;;  %v286_v23 = vpop.f32.mrb[6].mxu1 }
  0xe8   :  { %214 = vst [vmem:[#allocation2 + $0x38] sm:$0xff] %v278_v22  ;;  %222 = vst [vmem:[#allocation2 + $0x78] sm:$0xff] %v286_v23  ;;  %v163_v24 = vpop.f32.mrb[7].mxu0  ;;  %v195_v25 = vpop.f32.mrb[7].mxu1 }
  0xe9   :  { %212 = vst [vmem:[#allocation2 + $0x28] sm:$0xff] %v163_v24  ;;  %220 = vst [vmem:[#allocation2 + $0x68] sm:$0xff] %v195_v25 }
  0xea   :  { %315 = shalt.err (!%p312_p4)
}
  0xeb   :  { %s316_s4 = scalar_lea.hbm %s398_s2, 2048 }
  0xec   :  { %p317_p5 = scmp.ne.s32.totalorder %s398_s2, %s316_s4  ;;  %p320_p6 = scmp.lt.u32.totalorder %s316_s4, %s398_s2 }
  0xee   :  { %p322_p7 = pnand %p320_p6, %p317_p5 }
  0xf0   :  { %325 = shalt.err (!%p322_p7)
}
  0xf1   :  { %s329_s9 = smov 128   ;;  %s330_s10 = smov 8  }
  0xf2   :  { %234 = dma.vmem_to_hbm [thread:$0]  %s229_s28, 2048, %s398_s2, [#allocation3], %s329_s9, %s329_s9, %s330_s10  }
  0xf3   :  { %326 = dma.done.wait [#allocation3], 2048  }
  0xf4   :  { %327 = vsyncadd [#allocation3], 4294965248 }
  0xf5   :  { %238 = vsyncpa [#allocation3], 1 }

</bundles_post_ra>
